<compile_context>
chip_gen: v7x
topology: tpu7x:2x2x1
jax: 0.10.0
libtpu: 0.0.40
codegen_flags: <defaults>
</compile_context>

<pallas_src>
import jax
import jax.numpy as jnp
from jax.experimental import pallas as pl
from jax.experimental.pallas import tpu as pltpu


LANES = 128  # lane width for the aligned (rows, 128) layout


def _round_up(x, m):
    return ((x + m - 1) // m) * m


def _round_down(x, m):
    return (x // m) * m


def _pick_vmem_budget():
    """Scoped-VMEM limit and the block-byte budget, per chip generation."""
    try:
        cap = pltpu.get_tpu_info().vmem_capacity_bytes
    except Exception:  # pragma: no cover - defensive (e.g. interpret mode)
        cap = 64 * 1024 * 1024
    if cap >= 100 * 1024 * 1024:
        # v5e / v6e: 128 MiB physical VMEM -> generous scoped limit.
        vmem_limit = 64 * 1024 * 1024
    else:
        # v7x: 64 MiB physical VMEM per TensorCore -> keep limit <= ~48 MiB.
        vmem_limit = 48 * 1024 * 1024
    budget = (3 * vmem_limit) // 4  # ~75% of the limit for double-buffered blocks
    return vmem_limit, budget


def coreml_lama_kernel(w_ref, img_ref, mask_ref, out_ref):
    # w_ref:    (15,) f32 in SMEM; per output channel o:
    #           [wi0, wi1, wi2, (w_mask + bias), bias] all pre-scaled by 255.
    # img_ref:  (3, R, C) f32 VMEM  (one sample, all 3 channels)
    # mask_ref: (R, C)    f32 VMEM
    # out_ref:  (3, R, C) f32 VMEM

    # normalized_mask = ((mask > 0) * 1)  -> kept as a bool predicate.
    mbool = mask_ref[...] > 0

    # LaMa sees the image with the hole zeroed out (image * (1 - mask)).
    x0 = jnp.where(mbool, 0.0, img_ref[0])
    x1 = jnp.where(mbool, 0.0, img_ref[1])
    x2 = jnp.where(mbool, 0.0, img_ref[2])

    # Unrolled 1x1 conv as VPU FMAs with SMEM scalar weights (no MXU).
    # The *255 is already folded into the weights, so clamp directly.
    for o in range(3):
        acc = (w_ref[5 * o + 0] * x0
               + w_ref[5 * o + 1] * x1
               + w_ref[5 * o + 2] * x2
               + jnp.where(mbool, w_ref[5 * o + 3], w_ref[5 * o + 4]))
        out_ref[o] = jnp.clip(acc, 0.0, 255.0)


def _launch(params, img_b, msk_b, block_rc, grid, vmem_limit):
    """Shared pallas_call for both the aligned and ragged layouts."""
    br, bc = block_rc
    N = img_b.shape[0]
    L = N * img_b.shape[2] * img_b.shape[3]  # pixels processed
    return pl.pallas_call(
        coreml_lama_kernel,
        out_shape=jax.ShapeDtypeStruct(img_b.shape, jnp.float32),
        grid_spec=pltpu.PrefetchScalarGridSpec(
            num_scalar_prefetch=0,
            grid=grid,
            in_specs=[
                # 15 conv parameters, resident in SMEM, read as scalars.
                pl.BlockSpec(memory_space=pltpu.MemorySpace.SMEM),
                # image: one sample, all channels, lane/sublane-dense tile.
                pl.BlockSpec((None, 3, br, bc), lambda n, r: (n, 0, r, 0)),
                # mask: one sample, single channel (squeezed), same tile.
                pl.BlockSpec((None, None, br, bc), lambda n, r: (n, 0, r, 0)),
            ],
            out_specs=pl.BlockSpec((None, 3, br, bc), lambda n, r: (n, 0, r, 0)),
        ),
        compiler_params=pltpu.CompilerParams(
            dimension_semantics=("parallel", "parallel"),
            vmem_limit_bytes=vmem_limit,
        ),
        cost_estimate=pl.CostEstimate(
            flops=31 * L, transcendentals=0, bytes_accessed=28 * L),
    )(params, img_b, msk_b)


def coreml_lama(image, mask, w_img, w_mask, bias):
    """image: (N,3,H,W) f32, mask: (N,1,H,W) f32 -> (N,3,H,W) f32 in [0,255]."""
    N, C, H, W = image.shape
    assert C == 3 and mask.shape == (N, 1, H, W)
    HW = H * W

    vmem_limit, budget = _pick_vmem_budget()

    # Pre-fold the *255 and the (w_mask + bias) mask-branch into the 15 SMEM
    # scalars: per channel o -> [wi0, wi1, wi2, wm+b, b] * 255.
    params = (jnp.concatenate(
        [w_img,
         (w_mask.reshape(3) + bias).reshape(3, 1),
         bias.reshape(3, 1)], axis=1) * 255.0).reshape(15).astype(jnp.float32)

    # f32 bytes per pixel, double-buffered: 2 * (img 12 + mask 4 + out 12).
    bytes_per_px_dbuf = 2 * (3 + 1 + 3) * 4

    if HW % LANES == 0:
        # Fast path: free (layout-preserving) reshape of contiguous NCHW into
        # (rows, 128) lane-dense tiles. No padding / extra HBM passes.
        rows = HW // LANES
        max_rows = max(8, _round_down(budget // (bytes_per_px_dbuf * LANES), 8))
        block_rows = min(rows, max_rows)
        if N == 1 and rows > 8:
            # Keep >= 2 grid steps so both v7x TensorCores get work.
            block_rows = min(block_rows, _round_up(-(-rows // 2), 8))
        if block_rows < rows and block_rows % 8 != 0:
            block_rows = max(8, _round_down(block_rows, 8))

        img_b = image.reshape(N, 3, rows, LANES)
        msk_b = mask.reshape(N, 1, rows, LANES)
        grid = (N, pl.cdiv(rows, block_rows))
        out_b = _launch(params, img_b, msk_b, (block_rows, LANES), grid,
                        vmem_limit)
        return out_b.reshape(N, 3, H, W)

    # Ragged H*W: tile over H with a full-extent W last dim (the full-dim
    # exception to the (8,128) rule) so no host-side pad / slice passes.
    max_h = max(8, _round_down(budget // (bytes_per_px_dbuf * W), 8))
    block_h = min(H, max_h)
    if N == 1 and H > 8:
        block_h = min(block_h, _round_up(-(-H // 2), 8))
    if block_h < H and block_h % 8 != 0:
        block_h = max(8, _round_down(block_h, 8))
    grid = (N, pl.cdiv(H, block_h))
    return _launch(params, image, mask, (block_h, W), grid, vmem_limit)


def reference(image, mask, w_img, w_mask, bias):
    """Pure-JAX reference of the same computation (original, un-folded form)."""
    m = (mask > 0).astype(jnp.float32)                       # (N,1,H,W)
    masked_img = image * (1.0 - m)                           # (N,3,H,W)
    lama_out = (
        jnp.einsum("oc,nchw->nohw", w_img, masked_img)
        + jnp.einsum("oc,nchw->nohw", w_mask, m)
        + bias.reshape(1, 3, 1, 1)
    )
    return jnp.clip(lama_out * 255.0, 0.0, 255.0)


if __name__ == "__main__":
    key = jax.random.PRNGKey(0)
    k_img, k_msk, k_w1, k_w2, k_b = jax.random.split(key, 5)

    # Small shapes: batch=2, RGB image 16x16, single-channel mask.
    N, H, W = 2, 16, 16
    image = jax.random.uniform(k_img, (N, 3, H, W), dtype=jnp.float32)
    # Mask with mixed signs so binarization is exercised.
    mask = jax.random.normal(k_msk, (N, 1, H, W), dtype=jnp.float32)

    # Deterministic synthetic parameters for the 1x1-conv LaMa stand-in.
    w_img = 0.1 * jax.random.normal(k_w1, (3, 3), dtype=jnp.float32)
    w_mask = 0.1 * jax.random.normal(k_w2, (3, 1), dtype=jnp.float32)
    bias = 0.05 * jax.random.normal(k_b, (3,), dtype=jnp.float32)

    out = coreml_lama(image, mask, w_img, w_mask, bias)
    out = jax.block_until_ready(out)

    ref = reference(image, mask, w_img, w_mask, bias)
    assert out.shape == (N, 3, H, W)
    assert jnp.allclose(out, ref, atol=1e-3, rtol=1e-4), "mismatch vs reference"

    print("KERNEL_OK")
</pallas_src>

<mosaic_0001>
module attributes {stable_mosaic.version = 11 : i64} {
  func.func @coreml_lama_kernel(%arg0: i32, %arg1: i32, %arg2: memref<15xf32, #tpu.memory_space<smem>>, %arg3: memref<1x3x2x128xf32, #tpu.memory_space<vmem>>, %arg4: memref<1x1x2x128xf32, #tpu.memory_space<vmem>>, %arg5: memref<1x3x2x128xf32, #tpu.memory_space<vmem>>) attributes {dimension_semantics = [#tpu.dimension_semantics<parallel>, #tpu.dimension_semantics<parallel>], iteration_bounds = array<i64: 2, 1>, scalar_prefetch = 0 : i64, scratch_operands = 0 : i64, tpu.core_type = #tpu.core_type<tc>, window_params = [{transform_indices = @transform_0, window_bounds = array<i64: 15>}, {transform_indices = @transform_1, window_bounds = array<i64: 1, 3, 2, 128>}, {transform_indices = @transform_2, window_bounds = array<i64: 1, 1, 2, 128>}, {transform_indices = @transform_3, window_bounds = array<i64: 1, 3, 2, 128>}]} {
    %c0 = arith.constant 0 : index
    %c0_0 = arith.constant 0 : index
    %c0_1 = arith.constant 0 : index
    %c0_2 = arith.constant 0 : index
    %0 = vector.load %arg4[%c0, %c0_0, %c0_1, %c0_2] : memref<1x1x2x128xf32, #tpu.memory_space<vmem>>, vector<1x1x2x128xf32>
    %1 = vector.shape_cast %0 : vector<1x1x2x128xf32> to vector<2x128xf32>
    %cst = arith.constant 0.000000e+00 : f32
    %2 = vector.broadcast %cst : f32 to vector<2x128xf32>
    %3 = arith.cmpf ogt, %1, %2 : vector<2x128xf32>
    %c0_3 = arith.constant 0 : index
    %c0_4 = arith.constant 0 : index
    %c0_5 = arith.constant 0 : index
    %c0_6 = arith.constant 0 : index
    %4 = vector.load %arg3[%c0_3, %c0_4, %c0_5, %c0_6] : memref<1x3x2x128xf32, #tpu.memory_space<vmem>>, vector<1x1x2x128xf32>
    %5 = vector.shape_cast %4 : vector<1x1x2x128xf32> to vector<2x128xf32>
    %cst_7 = arith.constant 0.000000e+00 : f32
    %6 = vector.broadcast %cst_7 : f32 to vector<2x128xf32>
    %7 = arith.select %3, %6, %5 : vector<2x128xi1>, vector<2x128xf32>
    %c0_8 = arith.constant 0 : index
    %c1 = arith.constant 1 : index
    %c0_9 = arith.constant 0 : index
    %c0_10 = arith.constant 0 : index
    %8 = vector.load %arg3[%c0_8, %c1, %c0_9, %c0_10] : memref<1x3x2x128xf32, #tpu.memory_space<vmem>>, vector<1x1x2x128xf32>
    %9 = vector.shape_cast %8 : vector<1x1x2x128xf32> to vector<2x128xf32>
    %cst_11 = arith.constant 0.000000e+00 : f32
    %10 = vector.broadcast %cst_11 : f32 to vector<2x128xf32>
    %11 = arith.select %3, %10, %9 : vector<2x128xi1>, vector<2x128xf32>
    %c0_12 = arith.constant 0 : index
    %c2 = arith.constant 2 : index
    %c0_13 = arith.constant 0 : index
    %c0_14 = arith.constant 0 : index
    %12 = vector.load %arg3[%c0_12, %c2, %c0_13, %c0_14] : memref<1x3x2x128xf32, #tpu.memory_space<vmem>>, vector<1x1x2x128xf32>
    %13 = vector.shape_cast %12 : vector<1x1x2x128xf32> to vector<2x128xf32>
    %cst_15 = arith.constant 0.000000e+00 : f32
    %14 = vector.broadcast %cst_15 : f32 to vector<2x128xf32>
    %15 = arith.select %3, %14, %13 : vector<2x128xi1>, vector<2x128xf32>
    %c0_16 = arith.constant 0 : index
    %16 = memref.load %arg2[%c0_16] : memref<15xf32, #tpu.memory_space<smem>>
    %17 = vector.broadcast %16 : f32 to vector<2x128xf32>
    %18 = arith.mulf %17, %7 : vector<2x128xf32>
    %c1_17 = arith.constant 1 : index
    %19 = memref.load %arg2[%c1_17] : memref<15xf32, #tpu.memory_space<smem>>
    %20 = vector.broadcast %19 : f32 to vector<2x128xf32>
    %21 = arith.mulf %20, %11 : vector<2x128xf32>
    %22 = arith.addf %18, %21 : vector<2x128xf32>
    %c2_18 = arith.constant 2 : index
    %23 = memref.load %arg2[%c2_18] : memref<15xf32, #tpu.memory_space<smem>>
    %24 = vector.broadcast %23 : f32 to vector<2x128xf32>
    %25 = arith.mulf %24, %15 : vector<2x128xf32>
    %26 = arith.addf %22, %25 : vector<2x128xf32>
    %c3 = arith.constant 3 : index
    %27 = memref.load %arg2[%c3] : memref<15xf32, #tpu.memory_space<smem>>
    %c4 = arith.constant 4 : index
    %28 = memref.load %arg2[%c4] : memref<15xf32, #tpu.memory_space<smem>>
    %29 = vector.broadcast %27 : f32 to vector<2x128xf32>
    %30 = vector.broadcast %28 : f32 to vector<2x128xf32>
    %31 = arith.select %3, %29, %30 : vector<2x128xi1>, vector<2x128xf32>
    %32 = arith.addf %26, %31 : vector<2x128xf32>
    %cst_19 = arith.constant 0.000000e+00 : f32
    %cst_20 = arith.constant 2.550000e+02 : f32
    %33 = vector.broadcast %cst_19 : f32 to vector<2x128xf32>
    %34 = arith.maximumf %33, %32 : vector<2x128xf32>
    %35 = vector.broadcast %cst_20 : f32 to vector<2x128xf32>
    %36 = arith.minimumf %35, %34 : vector<2x128xf32>
    %c0_21 = arith.constant 0 : index
    %c0_22 = arith.constant 0 : index
    %c0_23 = arith.constant 0 : index
    %c0_24 = arith.constant 0 : index
    %37 = vector.load %arg5[%c0_21, %c0_22, %c0_23, %c0_24] : memref<1x3x2x128xf32, #tpu.memory_space<vmem>>, vector<1x1x2x128xf32>
    %38 = vector.shape_cast %37 : vector<1x1x2x128xf32> to vector<2x128xf32>
    %39 = vector.shape_cast %36 : vector<2x128xf32> to vector<1x1x2x128xf32>
    tpu.vector_store %arg5[%c0_21, %c0_22, %c0_23, %c0_24], %39 {strides = array<i32>} : memref<1x3x2x128xf32, #tpu.memory_space<vmem>>, vector<1x1x2x128xf32>,
    %c5 = arith.constant 5 : index
    %40 = memref.load %arg2[%c5] : memref<15xf32, #tpu.memory_space<smem>>
    %41 = vector.broadcast %40 : f32 to vector<2x128xf32>
    %42 = arith.mulf %41, %7 : vector<2x128xf32>
    %c6 = arith.constant 6 : index
    %43 = memref.load %arg2[%c6] : memref<15xf32, #tpu.memory_space<smem>>
    %44 = vector.broadcast %43 : f32 to vector<2x128xf32>
    %45 = arith.mulf %44, %11 : vector<2x128xf32>
    %46 = arith.addf %42, %45 : vector<2x128xf32>
    %c7 = arith.constant 7 : index
    %47 = memref.load %arg2[%c7] : memref<15xf32, #tpu.memory_space<smem>>
    %48 = vector.broadcast %47 : f32 to vector<2x128xf32>
    %49 = arith.mulf %48, %15 : vector<2x128xf32>
    %50 = arith.addf %46, %49 : vector<2x128xf32>
    %c8 = arith.constant 8 : index
    %51 = memref.load %arg2[%c8] : memref<15xf32, #tpu.memory_space<smem>>
    %c9 = arith.constant 9 : index
    %52 = memref.load %arg2[%c9] : memref<15xf32, #tpu.memory_space<smem>>
    %53 = vector.broadcast %51 : f32 to vector<2x128xf32>
    %54 = vector.broadcast %52 : f32 to vector<2x128xf32>
    %55 = arith.select %3, %53, %54 : vector<2x128xi1>, vector<2x128xf32>
    %56 = arith.addf %50, %55 : vector<2x128xf32>
    %cst_25 = arith.constant 0.000000e+00 : f32
    %cst_26 = arith.constant 2.550000e+02 : f32
    %57 = vector.broadcast %cst_25 : f32 to vector<2x128xf32>
    %58 = arith.maximumf %57, %56 : vector<2x128xf32>
    %59 = vector.broadcast %cst_26 : f32 to vector<2x128xf32>
    %60 = arith.minimumf %59, %58 : vector<2x128xf32>
    %c0_27 = arith.constant 0 : index
    %c1_28 = arith.constant 1 : index
    %c0_29 = arith.constant 0 : index
    %c0_30 = arith.constant 0 : index
    %61 = vector.load %arg5[%c0_27, %c1_28, %c0_29, %c0_30] : memref<1x3x2x128xf32, #tpu.memory_space<vmem>>, vector<1x1x2x128xf32>
    %62 = vector.shape_cast %61 : vector<1x1x2x128xf32> to vector<2x128xf32>
    %63 = vector.shape_cast %60 : vector<2x128xf32> to vector<1x1x2x128xf32>
    tpu.vector_store %arg5[%c0_27, %c1_28, %c0_29, %c0_30], %63 {strides = array<i32>} : memref<1x3x2x128xf32, #tpu.memory_space<vmem>>, vector<1x1x2x128xf32>,
    %c10 = arith.constant 10 : index
    %64 = memref.load %arg2[%c10] : memref<15xf32, #tpu.memory_space<smem>>
    %65 = vector.broadcast %64 : f32 to vector<2x128xf32>
    %66 = arith.mulf %65, %7 : vector<2x128xf32>
    %c11 = arith.constant 11 : index
    %67 = memref.load %arg2[%c11] : memref<15xf32, #tpu.memory_space<smem>>
    %68 = vector.broadcast %67 : f32 to vector<2x128xf32>
    %69 = arith.mulf %68, %11 : vector<2x128xf32>
    %70 = arith.addf %66, %69 : vector<2x128xf32>
    %c12 = arith.constant 12 : index
    %71 = memref.load %arg2[%c12] : memref<15xf32, #tpu.memory_space<smem>>
    %72 = vector.broadcast %71 : f32 to vector<2x128xf32>
    %73 = arith.mulf %72, %15 : vector<2x128xf32>
    %74 = arith.addf %70, %73 : vector<2x128xf32>
    %c13 = arith.constant 13 : index
    %75 = memref.load %arg2[%c13] : memref<15xf32, #tpu.memory_space<smem>>
    %c14 = arith.constant 14 : index
    %76 = memref.load %arg2[%c14] : memref<15xf32, #tpu.memory_space<smem>>
    %77 = vector.broadcast %75 : f32 to vector<2x128xf32>
    %78 = vector.broadcast %76 : f32 to vector<2x128xf32>
    %79 = arith.select %3, %77, %78 : vector<2x128xi1>, vector<2x128xf32>
    %80 = arith.addf %74, %79 : vector<2x128xf32>
    %cst_31 = arith.constant 0.000000e+00 : f32
    %cst_32 = arith.constant 2.550000e+02 : f32
    %81 = vector.broadcast %cst_31 : f32 to vector<2x128xf32>
    %82 = arith.maximumf %81, %80 : vector<2x128xf32>
    %83 = vector.broadcast %cst_32 : f32 to vector<2x128xf32>
    %84 = arith.minimumf %83, %82 : vector<2x128xf32>
    %c0_33 = arith.constant 0 : index
    %c2_34 = arith.constant 2 : index
    %c0_35 = arith.constant 0 : index
    %c0_36 = arith.constant 0 : index
    %85 = vector.load %arg5[%c0_33, %c2_34, %c0_35, %c0_36] : memref<1x3x2x128xf32, #tpu.memory_space<vmem>>, vector<1x1x2x128xf32>
    %86 = vector.shape_cast %85 : vector<1x1x2x128xf32> to vector<2x128xf32>
    %87 = vector.shape_cast %84 : vector<2x128xf32> to vector<1x1x2x128xf32>
    tpu.vector_store %arg5[%c0_33, %c2_34, %c0_35, %c0_36], %87 {strides = array<i32>} : memref<1x3x2x128xf32, #tpu.memory_space<vmem>>, vector<1x1x2x128xf32>,
    return
  }
  func.func @transform_0(%arg0: i32, %arg1: i32) -> i32 {
    %c0_i32 = arith.constant 0 : i32
    %c0_i32_0 = arith.constant 0 : i32
    return %c0_i32 : i32
  }
  func.func @transform_1(%arg0: i32, %arg1: i32) -> (i32, i32, i32, i32) {
    %c0_i32 = arith.constant 0 : i32
    %c0_i32_0 = arith.constant 0 : i32
    %c0_i32_1 = arith.constant 0 : i32
    return %arg0, %c0_i32, %arg1, %c0_i32_0 : i32, i32, i32, i32
  }
  func.func @transform_2(%arg0: i32, %arg1: i32) -> (i32, i32, i32, i32) {
    %c0_i32 = arith.constant 0 : i32
    %c0_i32_0 = arith.constant 0 : i32
    %c0_i32_1 = arith.constant 0 : i32
    return %arg0, %c0_i32, %arg1, %c0_i32_0 : i32, i32, i32, i32
  }
  func.func @transform_3(%arg0: i32, %arg1: i32) -> (i32, i32, i32, i32) {
    %c0_i32 = arith.constant 0 : i32
    %c0_i32_0 = arith.constant 0 : i32
    %c0_i32_1 = arith.constant 0 : i32
    return %arg0, %c0_i32, %arg1, %c0_i32_0 : i32, i32, i32, i32
  }
}

</mosaic_0001>

<bundles_post_ra>
// kernel: tpu_custom_call.1
= control target key start
LH: loop header
LB: loop body
LE: loop exit
PB: predicated region body
PF: predicated region fallthrough
CT: control target
= control target key end

     0   :  { %8 = vsyncpa [#allocation5], 0  ;;  %s933_s0 = inlined_call_operand.hbm [shape: f32[15], index: 0, kind: input, shape index: {}]   ;;  %s934_s1 = inlined_call_operand.hbm [shape: f32[2,3,2,128], index: 1, kind: input, shape index: {}]   ;;  %s935_s2 = inlined_call_operand.vmem [shape: f32[2,1,2,128], index: 2, kind: input, shape index: {}]   ;;  %s936_s3 = inlined_call_operand.hbm [shape: f32[2,3,2,128], index: 3, kind: output, shape index: {}]  }
   0x1   :  { %9 = vsyncpa [#allocation3], 0 }
   0x2   :  { %11 = vsyncpa [#allocation3 + $0x1], 0 }
   0x3   :  { %12 = vsyncpa [#allocation4], 0 }
   0x4   :  { %14 = vsyncpa [#allocation4 + $0x1], 0  ;;  %s714_s12 = smov 0   ;;  %s716_s13 = smov 0  }
   0x5   :  { %s718_s14 = smov 0   ;;  %s720_s15 = smov 0  }
   0x6   :  { %s722_s16 = smov 0   ;;  %s724_s17 = smov 0  }
   0x7 LB: > { %s445_s18 = sadd.s32 4294967295, %s685_s17   ;;  %s446_s19 = sadd.s32 4294967294, %s685_s17   ;;  %s685_s17 = sphi %s724_s17, %s20_s17   ;;  %s681_s16 = sphi %s722_s16, %s956_s16   ;;  %s677_s15 = sphi %s720_s15, %s955_s15   ;;  %s673_s14 = sphi %s718_s14, %s954_s14   ;;  %s669_s13 = sphi %s716_s13, %s953_s13   ;;  %s665_s12 = sphi %s714_s12, %s952_s12  }
   0x8   : > { %s62_s20 = sadd.s32 1, %s673_s14  ;;  %p69_p0 = scmp.ne.s32.totalorder %s673_s14, %s669_s13 }
   0x9   : > { %p70_p1 = scmp.eq.s32.totalorder %s685_s17, 0  ;;  %p75_p2 = scmp.ne.s32.totalorder %s669_s13, %s665_s12 }
   0xa   : > { %p752_p3 = scmp.eq.s32.totalorder %s445_s18, 0  ;;  %p129_p4 = scmp.eq.s32.totalorder %s445_s18, 1 }
   0xb   : > { %p71_p5 = por %p70_p1, %p69_p0  ;;  %p135_p6 = scmp.eq.s32.totalorder %s446_s19, 1 }
   0xc   : > { %s941_s21 = scalar_select %p752_p3, 1, 0 }
   0xd   : > { %p758_p7 = por %p752_p3, %p75_p2  ;;  %p762_p8 = por %p129_p4, %p69_p0 }
   0xe   : > { %p766_p9 = por %p135_p6, %p75_p2  ;;  %p447_p10 = scmp.ge.s32.totalorder %s685_s17, 1 }
   0xf   : > { %s942_s22 = scalar_select %p758_p7, 1, 0 }
  0x10   : > { %s943_s23 = scalar_select %p762_p8, 1, 0 }
  0x11   : > { %s944_s24 = scalar_select %p766_p9, 1, 0 }
  0x12   : > { %p142_p11 = scmp.lt.s32.totalorder %s685_s17, 3  ;;  %p500_p1 = scmp.lt.s32.totalorder %s685_s17, 2 }
  0x13   : > { %s164_s26 = sand.u32 1, %s673_s14   ;;  %s32_s28 = sadd.s32 1, %s681_s16 }
  0x14   : > { %p773_p13 = pnand %p447_p10, %p142_p11  ;;  %p781_p0 = pnand %p500_p1, %p71_p5 }
  0x15   : > { %s475_s29 = smul.u32 6, %s164_s26  ;;  %p34_p4 = scmp.ge.s32.totalorder %s32_s28, 2 }
  0x16   : > { %p487_p7 = pneg %p773_p13  ;;  %s556_s5 = scalar_lea.hbm %s933_s0, 16 }
  0x17   : > { %p557_p6 = scmp.ne.s32.totalorder %s933_s0, %s556_s5  ;;  %p563_p5 = scmp.lt.u32.totalorder %s556_s5, %s933_s0 }
  0x18   : > { %p488_p2 = pnand %p487_p7, %p752_p3 }
  0x1a   : > { %p558_p10 = pneg %p488_p2 }
  0x1c   : > { %p559_p11 = pnand %p558_p10, %p557_p6 }
  0x1e   : > { %p560_p12 = pneg %p559_p11 }
  0x20   : > { %p565_p1 = pnand %p563_p5, %p560_p12 }
  0x22   : > { %568 = shalt.err (!%p565_p1)
}
  0x23   : > { %s687_s10 = smov [#allocation2]   ;;  %s958_s28 = smov (%p34_p4, %s32_s28), 0 }
  0x24   : > { %490 = dma.hbm_to_smem (!%p488_p2), %s933_s0, 16, %s687_s10, [#allocation5]  }
  0x25   : > { %s476_s19 = smul.u32 96, %s681_s16  ;;  %s57_s30 = ssub.s32 %s681_s16, %s958_s28 }
  0x26   : > { %s168_s4 = scalar_lea.vmem [#allocation6], %s475_s29  ;;  %p60_p7 = scmp.eq.s32.totalorder %s57_s30, 0 }
  0x27   : > { %s176_s5 = sshll.u32 %s168_s4, 4  ;;  %s808_s8 = scalar_lea.hbm %s934_s1, %s476_s19  ;;  %s810_s5 = int_to_ptr.vmem [resolvable:$true] %s176_s5 }
  0x28   : > { %s815_s9 = scalar_select %p60_p7, %s673_s14, %s62_s20  }
  0x29   : > { %s817_s10 = scalar_lea.sflag [#allocation3], %s164_s26  ;;  %s569_s11 = scalar_lea.hbm %s808_s8, 96 }
  0x2a   : > { %p570_p12 = scmp.ne.s32.totalorder %s808_s8, %s569_s11  ;;  %p571_p2 = pneg %p781_p0 }
  0x2b   : > { %s574_s19 = scalar_lea.hbm %s934_s1, 192  ;;  %p575_p10 = scmp.lt.u32.totalorder %s808_s8, %s934_s1 }
  0x2c   : > { %p572_p4 = pnand %p571_p2, %p570_p12  ;;  %p576_p11 = scmp.lt.u32.totalorder %s574_s19, %s569_s11 }
  0x2d   : > { %p578_p1 = scmp.lt.u32.totalorder %s569_s11, %s808_s8 }
  0x2e   : > { %p573_p6 = pneg %p572_p4  ;;  %p577_p5 = por %p576_p11, %p575_p10 }
  0x30   : > { %p579_p7 = por %p578_p1, %p577_p5 }
  0x32   : > { %p580_p9 = pnand %p579_p7, %p573_p6 }
  0x34   : > { %583 = shalt.err (!%p580_p9)
}
  0x35   : > { %s584_s20 = scalar_lea.vmem %s810_s5, 96  ;;  %s688_s26 = smov [#allocation6]  }
  0x36   : > { %p585_p12 = scmp.ne.s32.totalorder %s810_s5, %s584_s20  ;;  %s589_s6 = sshll.u32 %s688_s26, 4  ;;  %s590_s6 = int_to_ptr.vmem [resolvable:$false] %s589_s6 }
  0x37   : > { %s591_s7 = scalar_lea.vmem %s590_s6, 192  ;;  %p592_p3 = scmp.lt.s32.totalorder %s810_s5, %s590_s6 }
  0x38   : > { %p587_p4 = pnand %p585_p12, %p571_p2  ;;  %p593_p10 = scmp.lt.s32.totalorder %s591_s7, %s584_s20 }
  0x3a   : > { %p588_p8 = pneg %p587_p4  ;;  %p594_p11 = por %p593_p10, %p592_p3 }
  0x3c   : > { %p595_p5 = pnand %p594_p11, %p588_p8 }
  0x3e   : > { %598 = shalt.err (!%p595_p5)
}
  0x3f   : > { %s689_s11 = smov 32   ;;  %s690_s29 = smov 2  }
  0x40   : > { %494 = dma.hbm_to_vmem [thread:$0]  (!%p781_p0), %s808_s8, 96, %s810_s5, %s817_s10, %s689_s11, %s689_s11, %s690_s29  }
  0x41   : > { %198 = sbr.rel (%p773_p13) target bundleno = 122 (0x7a), region = 32  ;;  %p947_p9 = scmp.ne.s32.totalorder (!%p773_p13), %s941_s21, 0 }
  0x48   : > { %652 = dma.done.wait (%p947_p9), [#allocation5], 16  }
  0x49   : > { %654 = vsyncadd (%p947_p9), [#allocation5], 4294967280  ;;  %s852_s18 = sand.u32 1, %s669_s13   ;;  %p948_p3 = scmp.ne.s32.totalorder %s942_s22, 0 }
  0x4a   : > { %s477_s19 = smul.u32 6, %s852_s18  ;;  %s205_s30 = scalar_lea.sflag [#allocation3], %s852_s18 }
  0x4c   : > { %s208_s27 = scalar_lea.vmem [#allocation6], %s477_s19 }
  0x4d   : > { %656 = dma.done.wait (%p948_p3), %s205_s30, 96  }
  0x4e   : > { %658 = vsyncadd (%p948_p3), %s205_s30, 4294967200 }
  0x4f   : > { %213 = sfence }
  0x50   : > { %p239_p8 = scmp.lt.s32.totalorder %s677_s15, 1  ;;  %s256_s21 = sld [smem:[#allocation2]]  ;;  %v248_v0 = vld [vmem:[%s208_s27] sm:$0x3]  ;;  %v454_v1 = vld [vmem:[%s208_s27 + $0x2] sm:$0x3] }
  0x51   : > { %s456_s25 = sld [smem:[#allocation2 + $0x1]]  ;;  %s457_s8 = sld [smem:[#allocation2 + $0x2]]  ;;  %v455_v2 = vld [vmem:[%s208_s27 + $0x4] sm:$0x3] }
  0x52   : > { %s240_s5 = scalar_select %p239_p8, %s677_s15, 1 }
  0x53   : > { %s864_s10 = sld [smem:[#allocation2 + $0x3]]  ;;  %s459_s20 = sld [smem:[#allocation2 + $0x4]] }
  0x54   : > { %s453_s4 = sshll.u32 %s240_s5, 1  ;;  %s460_s22 = sld [smem:[#allocation2 + $0x5]] }
  0x55   : > { %s245_s7 = scalar_lea.vmem %s935_s2, %s453_s4  ;;  %s461_s11 = sld [smem:[#allocation2 + $0x6]] }
  0x56   : > { %v246_v3 = vld [vmem:[%s245_s7] sm:$0x3]  ;;  %v257_v4 = vstv %s256_s21  ;;  %s462_s29 = sld [smem:[#allocation2 + $0x7]]  ;;  %s463_s30 = sld [smem:[#allocation2 + $0x8]] }
  0x57   : > { %vm247_vm0 = vcmp.gt.f32.partialorder %v246_v3, 0.0  ;;  %v260_v5 = vstv %s456_s25  ;;  %v264_v11 = vstv %s457_s8  ;;  %s464_s5 = sld [smem:[#allocation2 + $0x9]]  ;;  %s466_s27 = sld [smem:[#allocation2 + $0xa]] }
  0x58   : > { %v249_v6 = vsel %vm247_vm0, 0.0, %v248_v0  ;;  %v252_v7 = vsel %vm247_vm0, 0.0, %v454_v1  ;;  %v255_v8 = vsel %vm247_vm0, 0.0, %v455_v2  ;;  %s467_s4 = sld [smem:[#allocation2 + $0xb]]  ;;  %s468_s21 = sld [smem:[#allocation2 + $0xc]] }
  0x59   : > { %v258_v9 = vmul.f32 %v257_v4, %v249_v6  ;;  %v261_v10 = vmul.f32 %v260_v5, %v252_v7  ;;  %v269_v12 = vstv %s864_s10  ;;  %v265_v13 = vmul.f32 %v264_v11, %v255_v8  ;;  %s469_s25 = sld [smem:[#allocation2 + $0xd]]  ;;  %s470_s26 = sld [smem:[#allocation2 + $0xe]] }
  0x5a   : > { %v270_v14 = vstv %s459_s20  ;;  %v277_v17 = vstv %s460_s22  ;;  %s238_s8 = scalar_lea.vmem [#allocation7], %s477_s19  ;;  %s478_s20 = smul.u32 96, %s677_s15 }
  0x5b   : > { %v262_v15 = vadd.f32 %v261_v10, %v258_v9  ;;  %v271_v16 = vsel %vm247_vm0, %v269_v12, %v270_v14  ;;  %v278_v19 = vmul.f32 %v277_v17, %v249_v6  ;;  %v280_v20 = vstv %s461_s11  ;;  %s333_s10 = sshll.u32 %s238_s8, 4  ;;  %s319_s22 = scalar_lea.sflag [#allocation4], %s852_s18  ;;  %s879_s10 = int_to_ptr.vmem [resolvable:$true] %s333_s10 }
  0x5c   : > { %v284_v21 = vstv %s462_s29  ;;  %v281_v22 = vmul.f32 %v280_v20, %v252_v7  ;;  %v289_v24 = vstv %s463_s30  ;;  %s884_s19 = scalar_lea.hbm %s936_s3, %s478_s20  ;;  %s599_s11 = scalar_lea.vmem %s879_s10, 96 }
  0x5d   : > { %v266_v18 = vadd.f32 %v265_v13, %v262_v15  ;;  %v285_v23 = vmul.f32 %v284_v21, %v255_v8  ;;  %v290_v26 = vstv %s464_s5  ;;  %v298_v27 = vstv %s466_s27  ;;  %p600_p13 = scmp.ne.s32.totalorder %s879_s10, %s599_s11  ;;  %p949_p0 = scmp.ne.s32.totalorder %s943_s23, 0 }
  0x5e   : > { %v282_v28 = vadd.f32 %v281_v22, %v278_v19  ;;  %v291_v29 = vsel %vm247_vm0, %v289_v24, %v290_v26  ;;  %v299_v30 = vmul.f32 %v298_v27, %v249_v6  ;;  %v301_v31 = vstv %s467_s4  ;;  %s691_s15 = smov [#allocation7]  }
  0x5f   : > { %v272_v25 = vadd.f32 %v271_v16, %v266_v18  ;;  %v302_v33 = vmul.f32 %v301_v31, %v252_v7  ;;  %v305_v34 = vstv %s468_s21  ;;  %v310_v35 = vstv %s469_s25  ;;  %p601_p2 = pnand %p600_p13, %p949_p0  ;;  %s603_s29 = sshll.u32 %s691_s15, 4  ;;  %s604_s29 = int_to_ptr.vmem [resolvable:$false] %s603_s29 }
  0x60   : > { %v286_v36 = vadd.f32 %v285_v23, %v282_v28  ;;  %v306_v37 = vmul.f32 %v305_v34, %v255_v8  ;;  %v311_v38 = vstv %s470_s26  ;;  %s605_s30 = scalar_lea.vmem %s604_s29, 192  ;;  %p606_p1 = scmp.lt.s32.totalorder %s879_s10, %s604_s29 }
  0x61   : > { %v273_v32 = vmax.f32 %v272_v25, 0.0  ;;  %v303_v40 = vadd.f32 %v302_v33, %v299_v30  ;;  %v312_v42 = vsel %vm247_vm0, %v310_v35, %v311_v38  ;;  %p602_p6 = pneg %p601_p2  ;;  %p607_p7 = scmp.lt.s32.totalorder %s605_s30, %s599_s11 }
  0x62   : > { %v292_v41 = vadd.f32 %v291_v29, %v286_v36 }
  0x63   : > { %v274_v39 = vmin.f32 %v273_v32, 255.0  ;;  %v307_v43 = vadd.f32 %v306_v37, %v303_v40  ;;  %p608_p12 = por %p607_p7, %p606_p1 }
  0x64   : > { %v293_v44 = vmax.f32 %v292_v41, 0.0 }
  0x65   : > { %275 = vst [vmem:[%s238_s8] sm:$0x3] %v274_v39  ;;  %v313_v45 = vadd.f32 %v312_v42, %v307_v43  ;;  %p609_p4 = pnand %p608_p12, %p602_p6 }
  0x66   : > { %v294_v46 = vmin.f32 %v293_v44, 255.0 }
  0x67   : > { %v314_v47 = vmax.f32 %v313_v45, 0.0 }
  0x68   : > { %465 = vst [vmem:[%s238_s8 + $0x2] sm:$0x3] %v294_v46 }
  0x69   : > { %v315_v48 = vmin.f32 %v314_v47, 255.0 }
  0x6b   : > { %471 = vst [vmem:[%s238_s8 + $0x4] sm:$0x3] %v315_v48 }
  0x6c   : > { %612 = shalt.err (!%p609_p4)
}
  0x6d   : > { %s613_s5 = scalar_lea.hbm %s884_s19, 96  ;;  %s617_s21 = scalar_lea.hbm %s936_s3, 192 }
  0x6e   : > { %p614_p10 = scmp.ne.s32.totalorder %s884_s19, %s613_s5  ;;  %p618_p9 = scmp.lt.u32.totalorder %s884_s19, %s936_s3 }
  0x6f   : > { %p619_p3 = scmp.lt.u32.totalorder %s617_s21, %s613_s5  ;;  %p621_p13 = scmp.lt.u32.totalorder %s613_s5, %s884_s19 }
  0x70   : > { %p615_p11 = pnand %p614_p10, %p949_p0 }
  0x71   : > { %p620_p8 = por %p619_p3, %p618_p9 }
  0x72   : > { %p616_p5 = pneg %p615_p11 }
  0x73   : > { %p622_p2 = por %p621_p13, %p620_p8 }
  0x75   : > { %p623_p6 = pnand %p622_p2, %p616_p5 }
  0x77   : > { %626 = shalt.err (!%p623_p6)
}
  0x78   : > { %s692_s8 = smov 32   ;;  %s693_s20 = smov 2  }
  0x79   : > { %485 = dma.vmem_to_hbm [thread:$0]  (%p949_p0), %s879_s10, 96, %s884_s19, %s319_s22, %s692_s8, %s692_s8, %s693_s20  }
  0x7a PF: > { %s348_s6 = sand.u32 1, %s665_s12   ;;  %p950_p1 = scmp.ne.s32.totalorder %s944_s24, 0 }
  0x7b   : > { %p951_p7 = scmp.ge.s32.totalorder %s685_s17, 2  ;;  %s349_s7 = scalar_lea.sflag [#allocation4], %s348_s6 }
  0x7d   : > { %p496_p12 = pnand %p951_p7, %p950_p1 }
  0x7f   : > { %660 = dma.done.wait (!%p496_p12), %s349_s7, 96  }
  0x80   : > { %662 = vsyncadd (!%p496_p12), %s349_s7, 4294967200  ;;  %s20_s17 = sadd.s32 1, %s685_s17   ;;  %s952_s12 = smov %s669_s13 }
  0x81   : > { %p17_p4 = scmp.ge.s32.totalorder %s20_s17, 4   ;;  %s953_s13 = smov %s673_s14 }
  0x82   : > { %s954_s14 = smov %s815_s9  ;;  %s955_s15 = smov %s681_s16 }
  0x83   : > { %s956_s16 = smov %s958_s28  ;;  %19 = sbr.rel (!%p17_p4) target bundleno = 7 (0x7), region = 89 }
  0x8a   :  { %354 = vsyncpa [#allocation3], 1 }
  0x8b   :  { %356 = vsyncpa [#allocation3 + $0x1], 1 }
  0x8c   :  { %357 = vsyncpa [#allocation4], 1 }
  0x8d   :  { %359 = vsyncpa [#allocation4 + $0x1], 1 }
  0x8e   :  { %360 = vsyncpa [#allocation5], 1 }
  0x8f   :  { %362 = vsyncpa [#allocation5 + $0x1], 1 }

</bundles_post_ra>
